<compile_context>
chip_gen: v7x
topology: tpu7x:2x2x1
jax: 0.10.0
libtpu: 0.0.40
codegen_flags: <defaults>
</compile_context>

<pallas_src>
from functools import partial

import numpy as np
import jax
import jax.numpy as jnp
from jax.experimental import pallas as pl
from jax.experimental.pallas import tpu as pltpu

try:  # prefer the optimized C implementation if present
    from scipy.optimize import linear_sum_assignment as _scipy_lsa
except Exception:  # pragma: no cover
    _scipy_lsa = None


def _round_up(x, m):
    return ((x + m - 1) // m) * m


# ----------------------------------------------------------------------------
# Pallas kernel: one (TN, MT) block of one image's DETR matching cost matrix.
# ----------------------------------------------------------------------------
def _make_cost_kernel(use_focal, w_class, w_bbox, w_giou, alpha, gamma, eps):
    def kernel(logits_ref, pfeat_ref, oht_ref, tfeat_ref, c_ref):
        logits = logits_ref[...]        # (TN, C_pad) f32
        pf = pfeat_ref[...]             # (TN, 16): 0-3 cx,cy,w,h | 4-7 x0,y0,x1,y1 | 8 area1
        oht = oht_ref[...]              # (C_pad, MT) bf16: pure 0/1 one-hot^T for this image
        tf = tfeat_ref[...]             # (16, MT): 0-3 cx,cy,w,h | 4-7 x0,y0,x1,y1 | 8 area2

        def exact_gather(x):
            # Exact f32 gather via two native-rate bf16 MXU passes (x = hi + lo split):
            # with a 0/1 one-hot RHS the result equals hi+lo, i.e. x to ~2^-17 relative.
            hi = x.astype(jnp.bfloat16)
            lo = (x - hi.astype(jnp.float32)).astype(jnp.bfloat16)
            return (jnp.dot(hi, oht, preferred_element_type=jnp.float32)
                    + jnp.dot(lo, oht, preferred_element_type=jnp.float32))

        # ---- classification cost (gather via MXU, transform on (TN, MT)) ----------
        if use_focal:
            g = exact_gather(logits)                                  # (TN, MT) logits
            prob = 1.0 / (1.0 + jnp.exp(-g))                          # exact divide
            one_m_p = 1.0 - prob
            if gamma == 2.0:
                pos_w = one_m_p * one_m_p
                neg_w = prob * prob
            else:  # TODO(synk): generic gamma path untested on-device (pow lowering)
                pos_w = one_m_p ** gamma
                neg_w = prob ** gamma
            pos = alpha * pos_w * (-jnp.log(prob + 1e-8))
            neg = (1.0 - alpha) * neg_w * (-jnp.log(one_m_p + 1e-8))
            class_term = w_class * (pos - neg)                        # (TN, MT)
        else:
            m = jnp.max(logits, axis=-1, keepdims=True)
            e = jnp.exp(logits - m)                                   # (TN, C_pad)
            rowsum = jnp.sum(e, axis=-1, keepdims=True)               # (TN, 1)
            scale = (-w_class) / rowsum                               # exact, tiny (TN,1)
            class_term = exact_gather(e) * scale                      # (TN, MT)

        # ---- L1 box cost (cdist, p=1) on cxcywh -----------------------------------
        cost_bbox = (jnp.abs(pf[:, 0:1] - tf[0:1, :]) +
                     jnp.abs(pf[:, 1:2] - tf[1:2, :]) +
                     jnp.abs(pf[:, 2:3] - tf[2:3, :]) +
                     jnp.abs(pf[:, 3:4] - tf[3:4, :]))

        # ---- GIoU cost (corners / areas precomputed in the wrapper) ---------------
        px0, py0, px1, py1 = pf[:, 4:5], pf[:, 5:6], pf[:, 6:7], pf[:, 7:8]
        area1 = pf[:, 8:9]                                            # (TN, 1)
        tx0, ty0, tx1, ty1 = tf[4:5, :], tf[5:6, :], tf[6:7, :], tf[7:8, :]
        area2 = tf[8:9, :]                                            # (1, MT)

        iw = jnp.maximum(jnp.minimum(px1, tx1) - jnp.maximum(px0, tx0), 0.0)
        ih = jnp.maximum(jnp.minimum(py1, ty1) - jnp.maximum(py0, ty0), 0.0)
        inter = iw * ih                                               # (TN, MT)
        union = area1 + area2 - inter + eps

        cw = jnp.maximum(jnp.maximum(px1, tx1) - jnp.minimum(px0, tx0), 0.0)
        ch = jnp.maximum(jnp.maximum(py1, ty1) - jnp.minimum(py0, ty0), 0.0)
        carea = cw * ch + eps

        iou = inter / union                                           # exact divides
        giou = iou - (carea - union) / carea
        c_ref[...] = w_bbox * cost_bbox + class_term + w_giou * (-giou)

    return kernel


# ----------------------------------------------------------------------------
# Jitted wrapper: pad / precompute features, launch the kernel per image block.
# ----------------------------------------------------------------------------
@partial(jax.jit, static_argnames=("use_focal", "cost_class", "cost_bbox",
                                   "cost_giou", "alpha", "gamma", "eps"))
def _cost_matrix_padded(pred_logits, pred_boxes, ids_pad, boxes_pad, *,
                        use_focal, cost_class, cost_bbox, cost_giou,
                        alpha, gamma, eps):
    bs, nq, nc = pred_logits.shape
    MT = ids_pad.shape[1]                               # per-image target pad (mult of 128)
    C_pad = max(_round_up(nc, 128), 128)                # lane-dense logits / full-K matmul

    # query tiling: minimise padding with TN <= 256 (both TCs get work via the bs axis)
    nq8 = _round_up(nq, 8)
    n_tiles = max(1, pl.cdiv(nq8, 256))
    TN = _round_up(pl.cdiv(nq8, n_tiles), 8)
    nq_pad = TN * n_tiles

    # ---- prediction-side features --------------------------------------------
    logits = pred_logits.astype(jnp.float32)
    # padded class columns must vanish under softmax; harmless (never selected) for focal
    pad_val = 0.0 if use_focal else -1e30
    logits_p = jnp.pad(logits, ((0, 0), (0, nq_pad - nq), (0, C_pad - nc)),
                       constant_values=pad_val)

    pb = pred_boxes.astype(jnp.float32)
    cx, cy, w, h = pb[..., 0], pb[..., 1], pb[..., 2], pb[..., 3]
    x0, y0, x1, y1 = cx - 0.5 * w, cy - 0.5 * h, cx + 0.5 * w, cy + 0.5 * h
    area1 = (x1 - x0) * (y1 - y0)
    pstack = jnp.stack([cx, cy, w, h, x0, y0, x1, y1, area1], axis=-1)   # (bs, nq, 9)
    pfeat = jnp.pad(pstack, ((0, 0), (0, nq_pad - nq), (0, 16 - 9)))

    # ---- target-side features (per image, lane-major) -------------------------
    tb = boxes_pad.astype(jnp.float32)                                   # (bs, MT, 4)
    tcx, tcy, tw, th = tb[..., 0], tb[..., 1], tb[..., 2], tb[..., 3]
    tx0, ty0, tx1, ty1 = tcx - 0.5 * tw, tcy - 0.5 * th, tcx + 0.5 * tw, tcy + 0.5 * th
    area2 = (tx1 - tx0) * (ty1 - ty0)
    tstack = jnp.stack([tcx, tcy, tw, th, tx0, ty0, tx1, ty1, area2], axis=1)  # (bs, 9, MT)
    tfeat = jnp.pad(tstack, ((0, 0), (0, 16 - 9), (0, 0)))

    # one-hot kept pure 0/1 bf16 (exact); padded ids (== nc) give all-zero columns
    oh = jax.nn.one_hot(ids_pad, nc, dtype=jnp.bfloat16, axis=1)         # (bs, nc, MT)
    oht = jnp.pad(oh, ((0, 0), (0, C_pad - nc), (0, 0)))                 # (bs, C_pad, MT)

    kernel = _make_cost_kernel(use_focal, cost_class, cost_bbox, cost_giou,
                               alpha, gamma, eps)

    # scoped-VMEM headroom for large vocabularies / many targets (double-buffered blocks)
    est = 2 * (TN * C_pad * 4 + TN * 16 * 4 + C_pad * MT * 2 + 16 * MT * 4 + TN * MT * 4)
    vmem_limit = None
    if est > 16 * 1024 * 1024:
        vmem_limit = int(min(2 * est, 64 * 1024 * 1024))

    C = pl.pallas_call(
        kernel,
        out_shape=jax.ShapeDtypeStruct((bs, nq_pad, MT), jnp.float32),
        grid=(bs, nq_pad // TN),
        in_specs=[
            pl.BlockSpec((None, TN, C_pad), lambda b, i: (b, i, 0)),
            pl.BlockSpec((None, TN, 16), lambda b, i: (b, i, 0)),
            pl.BlockSpec((None, C_pad, MT), lambda b, i: (b, 0, 0)),
            pl.BlockSpec((None, 16, MT), lambda b, i: (b, 0, 0)),
        ],
        out_specs=pl.BlockSpec((None, TN, MT), lambda b, i: (b, i, 0)),
        compiler_params=pltpu.CompilerParams(
            dimension_semantics=("parallel", "parallel"),
            vmem_limit_bytes=vmem_limit),
    )(logits_p, pfeat, oht, tfeat)

    return C[:, :nq, :]                                                  # (bs, nq, MT)


def compute_cost_matrix(pred_logits, pred_boxes, gt_classes, gt_bboxes, *,
                        cost_class=1.0, cost_bbox=1.0, cost_giou=1.0,
                        use_focal=False, alpha=0.25, gamma=2.0, eps=1e-6):
    """Per-image (block-diagonal) cost blocks: returns (C[bs, nq, MT], sizes)."""
    bs, _, nc = pred_logits.shape
    sizes = [int(np.asarray(b).shape[0]) for b in gt_bboxes]
    MT = max(_round_up(max(sizes + [1]), 128), 128)
    ids_np = np.full((bs, MT), nc, dtype=np.int32)        # nc == out of range -> zero one-hot
    boxes_np = np.zeros((bs, MT, 4), dtype=np.float32)
    for i, (ci, bi) in enumerate(zip(gt_classes, gt_bboxes)):
        s = sizes[i]
        if s:
            ids_np[i, :s] = np.asarray(ci).astype(np.int32)
            boxes_np[i, :s] = np.asarray(bi, dtype=np.float32)
    C = _cost_matrix_padded(
        jnp.asarray(pred_logits), jnp.asarray(pred_boxes),
        jnp.asarray(ids_np), jnp.asarray(boxes_np),
        use_focal=bool(use_focal), cost_class=float(cost_class),
        cost_bbox=float(cost_bbox), cost_giou=float(cost_giou),
        alpha=float(alpha), gamma=float(gamma), eps=float(eps))
    return C, sizes


# ----------------------------------------------------------------------------
# Host-side Hungarian (linear_sum_assignment). scipy if available, else a
# numpy-vectorized JV implementation.
# TODO(synk): the combinatorial assignment has no clean Pallas equivalent; it stays host-side
#             (and could be overlapped with the next batch's cost-matrix kernel).
# ----------------------------------------------------------------------------
def _linear_sum_assignment(cost):
    cost = np.asarray(cost, dtype=np.float64)
    if cost.shape[1] == 0 or cost.shape[0] == 0:
        return np.zeros((0,), np.int64), np.zeros((0,), np.int64)
    if _scipy_lsa is not None:
        r, c = _scipy_lsa(cost)
        return np.asarray(r, dtype=np.int64), np.asarray(c, dtype=np.int64)

    transposed = False
    if cost.shape[0] > cost.shape[1]:
        cost = cost.T
        transposed = True
    n, m = cost.shape
    INF = float("inf")
    u = np.zeros(n + 1)
    v = np.zeros(m + 1)
    p = np.zeros(m + 1, dtype=np.int64)     # p[j]: row matched to column j (1-indexed)
    way = np.zeros(m + 1, dtype=np.int64)
    for i in range(1, n + 1):
        p[0] = i
        j0 = 0
        minv = np.full(m + 1, INF)
        used = np.zeros(m + 1, dtype=bool)
        while True:
            used[j0] = True
            i0 = p[j0]
            free = ~used[1:]
            cur = cost[i0 - 1, :] - u[i0] - v[1:]
            better = free & (cur < minv[1:])
            minv[1:][better] = cur[better]
            way[1:][better] = j0
            masked = np.where(free, minv[1:], INF)
            j1 = int(np.argmin(masked)) + 1
            delta = masked[j1 - 1]
            used_j = np.nonzero(used)[0]
            u[p[used_j]] += delta
            v[used_j] -= delta
            minv[~used] -= delta
            j0 = j1
            if p[j0] == 0:
                break
        while True:
            j1 = way[j0]
            p[j0] = p[j1]
            j0 = j1
            if j0 == 0:
                break
    rows, cols = [], []
    for j in range(1, m + 1):
        if p[j] != 0:
            rows.append(p[j] - 1)
            cols.append(j - 1)
    rows = np.asarray(rows, dtype=np.int64)
    cols = np.asarray(cols, dtype=np.int64)
    if transposed:
        rows, cols = cols, rows
    order = np.argsort(rows)
    return rows[order], cols[order]


def hungarian_matcher(pred_logits, pred_boxes, gt_classes, gt_bboxes, **kw):
    """JAX/Pallas port of HungarianMatcher.forward."""
    C, sizes = compute_cost_matrix(pred_logits, pred_boxes, gt_classes, gt_bboxes, **kw)
    C_np = np.asarray(jax.block_until_ready(C))            # (bs, nq, MT) per-image blocks
    indices = []
    for i, s in enumerate(sizes):
        ri, ci = _linear_sum_assignment(C_np[i, :, :s])
        indices.append((ri.astype(np.int64), ci.astype(np.int64)))
    return indices, C


# ----------------------------------------------------------------------------
# numpy (float64) reference for the cost matrix (both class-cost branches)
# ----------------------------------------------------------------------------
def _ref_cost(pred_logits, pred_boxes, tgt_ids, tgt_bbox,
              w_class=1.0, w_bbox=1.0, w_giou=1.0,
              use_focal=False, alpha=0.25, gamma=2.0, eps=1e-6):
    pl_, pb, ti, tb = (np.asarray(x, np.float64) for x in
                       (pred_logits, pred_boxes, tgt_ids, tgt_bbox))
    bs, nq, nc = pl_.shape
    logits = pl_.reshape(-1, nc)
    ti = ti.astype(np.int64)
    if use_focal:
        prob = 1.0 / (1.0 + np.exp(-logits))
        neg = (1.0 - alpha) * (prob ** gamma) * (-np.log(1.0 - prob + 1e-8))
        pos = alpha * ((1.0 - prob) ** gamma) * (-np.log(prob + 1e-8))
        cost_class = pos[:, ti] - neg[:, ti]
    else:
        prob = np.exp(logits - logits.max(-1, keepdims=True))
        prob /= prob.sum(-1, keepdims=True)
        cost_class = -prob[:, ti]
    ob = pb.reshape(-1, 4)
    cost_bbox = np.abs(ob[:, None, :] - tb[None, :, :]).sum(-1)

    def corners(b):
        return np.stack([b[:, 0] - b[:, 2] / 2, b[:, 1] - b[:, 3] / 2,
                         b[:, 0] + b[:, 2] / 2, b[:, 1] + b[:, 3] / 2], -1)
    b1, b2 = corners(ob), corners(tb)
    a1 = (b1[:, 2] - b1[:, 0]) * (b1[:, 3] - b1[:, 1])
    a2 = (b2[:, 2] - b2[:, 0]) * (b2[:, 3] - b2[:, 1])
    lt = np.maximum(b1[:, None, :2], b2[None, :, :2])
    rb = np.minimum(b1[:, None, 2:], b2[None, :, 2:])
    wh = np.clip(rb - lt, 0, None)
    inter = wh[..., 0] * wh[..., 1]
    union = a1[:, None] + a2[None, :] - inter + eps
    iou = inter / union
    lt2 = np.minimum(b1[:, None, :2], b2[None, :, :2])
    rb2 = np.maximum(b1[:, None, 2:], b2[None, :, 2:])
    wh2 = np.clip(rb2 - lt2, 0, None)
    area = wh2[..., 0] * wh2[..., 1] + eps
    giou = iou - (area - union) / area
    C = w_bbox * cost_bbox + w_class * cost_class + w_giou * (-giou)
    return C.reshape(bs, nq, -1)


def _check_blocks(C_blocks, C_ref, sizes, rtol=2e-3, atol=2e-3):
    off = 0
    for i, s in enumerate(sizes):
        np.testing.assert_allclose(np.asarray(C_blocks)[i, :, :s],
                                   C_ref[i, :, off:off + s], rtol=rtol, atol=atol)
        off += s


if __name__ == "__main__":
    key = jax.random.PRNGKey(0)
    bs, nq, nc = 2, 8, 8
    sizes = [3, 5]

    k1, k2, k3, k4 = jax.random.split(key, 4)
    pred_logits = jax.random.normal(k1, (bs, nq, nc), dtype=jnp.float32)
    # pred boxes in cxcywh, well inside [0,1]
    pred_boxes = jnp.concatenate(
        [jax.random.uniform(k2, (bs, nq, 2), minval=0.2, maxval=0.8),
         jax.random.uniform(k3, (bs, nq, 2), minval=0.05, maxval=0.3)], axis=-1)

    gt_classes, gt_bboxes = [], []
    for s in sizes:
        kc, kb1, kb2, k4 = jax.random.split(k4, 4)
        gt_classes.append(jax.random.randint(kc, (s,), 0, nc))
        gt_bboxes.append(jnp.concatenate(
            [jax.random.uniform(kb1, (s, 2), minval=0.2, maxval=0.8),
             jax.random.uniform(kb2, (s, 2), minval=0.05, maxval=0.3)], axis=-1))

    tgt_ids = jnp.concatenate(gt_classes)
    tgt_bbox = jnp.concatenate(gt_bboxes)

    # ---- softmax classification branch (default HungarianMatcher config) ------
    indices, C = hungarian_matcher(pred_logits, pred_boxes, gt_classes, gt_bboxes,
                                   cost_class=1.0, cost_bbox=1.0, cost_giou=1.0,
                                   use_focal=False)
    C_ref = _ref_cost(pred_logits, pred_boxes, tgt_ids, tgt_bbox,
                      w_class=1.0, w_bbox=1.0, w_giou=1.0, use_focal=False)
    _check_blocks(C, C_ref, sizes)
    for (ri, ci), s in zip(indices, sizes):
        assert len(ri) == len(ci) == min(nq, s)
        assert len(set(ri.tolist())) == len(ri)
        assert len(set(ci.tolist())) == len(ci)

    # ---- focal classification branch ------------------------------------------
    C_focal, focal_sizes = compute_cost_matrix(
        pred_logits, pred_boxes, gt_classes, gt_bboxes,
        cost_class=2.0, cost_bbox=5.0, cost_giou=2.0,
        use_focal=True, alpha=0.25, gamma=2.0)
    C_focal = jax.block_until_ready(C_focal)
    C_focal_ref = _ref_cost(pred_logits, pred_boxes, tgt_ids, tgt_bbox,
                            w_class=2.0, w_bbox=5.0, w_giou=2.0,
                            use_focal=True, alpha=0.25, gamma=2.0)
    _check_blocks(C_focal, C_focal_ref, focal_sizes)

    jax.block_until_ready(C)
    print("KERNEL_OK")
</pallas_src>

<mosaic_0001>
module attributes {stable_mosaic.version = 11 : i64} {
  func.func @kernel(%arg0: i32, %arg1: i32, %arg2: memref<1x8x128xf32, #tpu.memory_space<vmem>>, %arg3: memref<1x8x16xf32, #tpu.memory_space<vmem>>, %arg4: memref<1x128x128xbf16, #tpu.memory_space<vmem>>, %arg5: memref<1x16x128xf32, #tpu.memory_space<vmem>>, %arg6: memref<1x8x128xf32, #tpu.memory_space<vmem>>) attributes {dimension_semantics = [#tpu.dimension_semantics<parallel>, #tpu.dimension_semantics<parallel>], iteration_bounds = array<i64: 2, 1>, scalar_prefetch = 0 : i64, scratch_operands = 0 : i64, tpu.core_type = #tpu.core_type<tc>, window_params = [{transform_indices = @transform_0, window_bounds = array<i64: 1, 8, 128>}, {transform_indices = @transform_1, window_bounds = array<i64: 1, 8, 16>}, {transform_indices = @transform_2, window_bounds = array<i64: 1, 128, 128>}, {transform_indices = @transform_3, window_bounds = array<i64: 1, 16, 128>}, {transform_indices = @transform_4, window_bounds = array<i64: 1, 8, 128>}]} {
    %c0 = arith.constant 0 : index
    %c0_0 = arith.constant 0 : index
    %c0_1 = arith.constant 0 : index
    %0 = vector.load %arg2[%c0, %c0_0, %c0_1] : memref<1x8x128xf32, #tpu.memory_space<vmem>>, vector<1x8x128xf32>
    %1 = vector.shape_cast %0 : vector<1x8x128xf32> to vector<8x128xf32>
    %c0_2 = arith.constant 0 : index
    %c0_3 = arith.constant 0 : index
    %c0_4 = arith.constant 0 : index
    %2 = vector.load %arg3[%c0_2, %c0_3, %c0_4] : memref<1x8x16xf32, #tpu.memory_space<vmem>>, vector<1x8x16xf32>
    %3 = vector.shape_cast %2 : vector<1x8x16xf32> to vector<8x16xf32>
    %c0_5 = arith.constant 0 : index
    %c0_6 = arith.constant 0 : index
    %c0_7 = arith.constant 0 : index
    %4 = vector.load %arg4[%c0_5, %c0_6, %c0_7] : memref<1x128x128xbf16, #tpu.memory_space<vmem>>, vector<1x128x128xbf16>
    %5 = vector.shape_cast %4 : vector<1x128x128xbf16> to vector<128x128xbf16>
    %c0_8 = arith.constant 0 : index
    %c0_9 = arith.constant 0 : index
    %c0_10 = arith.constant 0 : index
    %6 = vector.load %arg5[%c0_8, %c0_9, %c0_10] : memref<1x16x128xf32, #tpu.memory_space<vmem>>, vector<1x16x128xf32>
    %7 = vector.shape_cast %6 : vector<1x16x128xf32> to vector<16x128xf32>
    %cst = arith.constant dense<0xFF800000> : vector<8xf32>
    %8 = vector.multi_reduction <maximumf>, %1, %cst [1] : vector<8x128xf32> to vector<8xf32>
    %9 = vector.shape_cast %8 : vector<8xf32> to vector<8x1xf32>
    %10 = vector.broadcast %9 : vector<8x1xf32> to vector<8x128xf32>
    %11 = arith.subf %1, %10 : vector<8x128xf32>
    %12 = math.exp %11 : vector<8x128xf32>
    %cst_11 = arith.constant dense<0.000000e+00> : vector<8xf32>
    %13 = vector.multi_reduction <add>, %12, %cst_11 [1] : vector<8x128xf32> to vector<8xf32>
    %14 = vector.shape_cast %13 : vector<8xf32> to vector<8x1xf32>
    %cst_12 = arith.constant -1.000000e+00 : f32
    %15 = vector.broadcast %cst_12 : f32 to vector<8x1xf32>
    %16 = arith.divf %15, %14 : vector<8x1xf32>
    %17 = arith.truncf %12 : vector<8x128xf32> to vector<8x128xbf16>
    %18 = arith.extf %17 : vector<8x128xbf16> to vector<8x128xf32>
    %19 = arith.subf %12, %18 : vector<8x128xf32>
    %20 = arith.truncf %19 : vector<8x128xf32> to vector<8x128xbf16>
    %cst_13 = arith.constant dense<0.000000e+00> : vector<8x128xf32>
    %21 = tpu.matmul %17, %5, %cst_13 {dimension_numbers = #tpu.dot_dimension_numbers<[1], [0], [0], [1], [0, 0, 1, 1], [], []>} : vector<8x128xbf16>, vector<128x128xbf16>, vector<8x128xf32> -> vector<8x128xf32>
    %cst_14 = arith.constant dense<0.000000e+00> : vector<8x128xf32>
    %22 = tpu.matmul %20, %5, %cst_14 {dimension_numbers = #tpu.dot_dimension_numbers<[1], [0], [0], [1], [0, 0, 1, 1], [], []>} : vector<8x128xbf16>, vector<128x128xbf16>, vector<8x128xf32> -> vector<8x128xf32>
    %23 = arith.addf %21, %22 : vector<8x128xf32>
    %24 = vector.broadcast %16 : vector<8x1xf32> to vector<8x128xf32>
    %25 = arith.mulf %23, %24 : vector<8x128xf32>
    %26 = vector.extract_strided_slice %3 {offsets = [0, 0], sizes = [8, 1], strides = [1, 1]} : vector<8x16xf32> to vector<8x1xf32>
    %27 = vector.extract_strided_slice %7 {offsets = [0, 0], sizes = [1, 128], strides = [1, 1]} : vector<16x128xf32> to vector<1x128xf32>
    %28 = vector.broadcast %26 : vector<8x1xf32> to vector<8x128xf32>
    %29 = vector.broadcast %27 : vector<1x128xf32> to vector<8x128xf32>
    %30 = arith.subf %28, %29 : vector<8x128xf32>
    %31 = math.absf %30 : vector<8x128xf32>
    %32 = vector.extract_strided_slice %3 {offsets = [0, 1], sizes = [8, 1], strides = [1, 1]} : vector<8x16xf32> to vector<8x1xf32>
    %33 = vector.extract_strided_slice %7 {offsets = [1, 0], sizes = [1, 128], strides = [1, 1]} : vector<16x128xf32> to vector<1x128xf32>
    %34 = vector.broadcast %32 : vector<8x1xf32> to vector<8x128xf32>
    %35 = vector.broadcast %33 : vector<1x128xf32> to vector<8x128xf32>
    %36 = arith.subf %34, %35 : vector<8x128xf32>
    %37 = math.absf %36 : vector<8x128xf32>
    %38 = arith.addf %31, %37 : vector<8x128xf32>
    %39 = vector.extract_strided_slice %3 {offsets = [0, 2], sizes = [8, 1], strides = [1, 1]} : vector<8x16xf32> to vector<8x1xf32>
    %40 = vector.extract_strided_slice %7 {offsets = [2, 0], sizes = [1, 128], strides = [1, 1]} : vector<16x128xf32> to vector<1x128xf32>
    %41 = vector.broadcast %39 : vector<8x1xf32> to vector<8x128xf32>
    %42 = vector.broadcast %40 : vector<1x128xf32> to vector<8x128xf32>
    %43 = arith.subf %41, %42 : vector<8x128xf32>
    %44 = math.absf %43 : vector<8x128xf32>
    %45 = arith.addf %38, %44 : vector<8x128xf32>
    %46 = vector.extract_strided_slice %3 {offsets = [0, 3], sizes = [8, 1], strides = [1, 1]} : vector<8x16xf32> to vector<8x1xf32>
    %47 = vector.extract_strided_slice %7 {offsets = [3, 0], sizes = [1, 128], strides = [1, 1]} : vector<16x128xf32> to vector<1x128xf32>
    %48 = vector.broadcast %46 : vector<8x1xf32> to vector<8x128xf32>
    %49 = vector.broadcast %47 : vector<1x128xf32> to vector<8x128xf32>
    %50 = arith.subf %48, %49 : vector<8x128xf32>
    %51 = math.absf %50 : vector<8x128xf32>
    %52 = arith.addf %45, %51 : vector<8x128xf32>
    %53 = vector.extract_strided_slice %3 {offsets = [0, 4], sizes = [8, 1], strides = [1, 1]} : vector<8x16xf32> to vector<8x1xf32>
    %54 = vector.extract_strided_slice %3 {offsets = [0, 5], sizes = [8, 1], strides = [1, 1]} : vector<8x16xf32> to vector<8x1xf32>
    %55 = vector.extract_strided_slice %3 {offsets = [0, 6], sizes = [8, 1], strides = [1, 1]} : vector<8x16xf32> to vector<8x1xf32>
    %56 = vector.extract_strided_slice %3 {offsets = [0, 7], sizes = [8, 1], strides = [1, 1]} : vector<8x16xf32> to vector<8x1xf32>
    %57 = vector.extract_strided_slice %3 {offsets = [0, 8], sizes = [8, 1], strides = [1, 1]} : vector<8x16xf32> to vector<8x1xf32>
    %58 = vector.extract_strided_slice %7 {offsets = [4, 0], sizes = [1, 128], strides = [1, 1]} : vector<16x128xf32> to vector<1x128xf32>
    %59 = vector.extract_strided_slice %7 {offsets = [5, 0], sizes = [1, 128], strides = [1, 1]} : vector<16x128xf32> to vector<1x128xf32>
    %60 = vector.extract_strided_slice %7 {offsets = [6, 0], sizes = [1, 128], strides = [1, 1]} : vector<16x128xf32> to vector<1x128xf32>
    %61 = vector.extract_strided_slice %7 {offsets = [7, 0], sizes = [1, 128], strides = [1, 1]} : vector<16x128xf32> to vector<1x128xf32>
    %62 = vector.extract_strided_slice %7 {offsets = [8, 0], sizes = [1, 128], strides = [1, 1]} : vector<16x128xf32> to vector<1x128xf32>
    %63 = vector.broadcast %55 : vector<8x1xf32> to vector<8x128xf32>
    %64 = vector.broadcast %60 : vector<1x128xf32> to vector<8x128xf32>
    %65 = arith.minimumf %63, %64 : vector<8x128xf32>
    %66 = vector.broadcast %53 : vector<8x1xf32> to vector<8x128xf32>
    %67 = vector.broadcast %58 : vector<1x128xf32> to vector<8x128xf32>
    %68 = arith.maximumf %66, %67 : vector<8x128xf32>
    %69 = arith.subf %65, %68 : vector<8x128xf32>
    %cst_15 = arith.constant 0.000000e+00 : f32
    %70 = vector.broadcast %cst_15 : f32 to vector<8x128xf32>
    %71 = arith.maximumf %69, %70 : vector<8x128xf32>
    %72 = vector.broadcast %56 : vector<8x1xf32> to vector<8x128xf32>
    %73 = vector.broadcast %61 : vector<1x128xf32> to vector<8x128xf32>
    %74 = arith.minimumf %72, %73 : vector<8x128xf32>
    %75 = vector.broadcast %54 : vector<8x1xf32> to vector<8x128xf32>
    %76 = vector.broadcast %59 : vector<1x128xf32> to vector<8x128xf32>
    %77 = arith.maximumf %75, %76 : vector<8x128xf32>
    %78 = arith.subf %74, %77 : vector<8x128xf32>
    %cst_16 = arith.constant 0.000000e+00 : f32
    %79 = vector.broadcast %cst_16 : f32 to vector<8x128xf32>
    %80 = arith.maximumf %78, %79 : vector<8x128xf32>
    %81 = arith.mulf %71, %80 : vector<8x128xf32>
    %82 = vector.broadcast %57 : vector<8x1xf32> to vector<8x128xf32>
    %83 = vector.broadcast %62 : vector<1x128xf32> to vector<8x128xf32>
    %84 = arith.addf %82, %83 : vector<8x128xf32>
    %85 = arith.subf %84, %81 : vector<8x128xf32>
    %cst_17 = arith.constant 9.99999997E-7 : f32
    %86 = vector.broadcast %cst_17 : f32 to vector<8x128xf32>
    %87 = arith.addf %85, %86 : vector<8x128xf32>
    %88 = vector.broadcast %55 : vector<8x1xf32> to vector<8x128xf32>
    %89 = vector.broadcast %60 : vector<1x128xf32> to vector<8x128xf32>
    %90 = arith.maximumf %88, %89 : vector<8x128xf32>
    %91 = vector.broadcast %53 : vector<8x1xf32> to vector<8x128xf32>
    %92 = vector.broadcast %58 : vector<1x128xf32> to vector<8x128xf32>
    %93 = arith.minimumf %91, %92 : vector<8x128xf32>
    %94 = arith.subf %90, %93 : vector<8x128xf32>
    %cst_18 = arith.constant 0.000000e+00 : f32
    %95 = vector.broadcast %cst_18 : f32 to vector<8x128xf32>
    %96 = arith.maximumf %94, %95 : vector<8x128xf32>
    %97 = vector.broadcast %56 : vector<8x1xf32> to vector<8x128xf32>
    %98 = vector.broadcast %61 : vector<1x128xf32> to vector<8x128xf32>
    %99 = arith.maximumf %97, %98 : vector<8x128xf32>
    %100 = vector.broadcast %54 : vector<8x1xf32> to vector<8x128xf32>
    %101 = vector.broadcast %59 : vector<1x128xf32> to vector<8x128xf32>
    %102 = arith.minimumf %100, %101 : vector<8x128xf32>
    %103 = arith.subf %99, %102 : vector<8x128xf32>
    %cst_19 = arith.constant 0.000000e+00 : f32
    %104 = vector.broadcast %cst_19 : f32 to vector<8x128xf32>
    %105 = arith.maximumf %103, %104 : vector<8x128xf32>
    %106 = arith.mulf %96, %105 : vector<8x128xf32>
    %cst_20 = arith.constant 9.99999997E-7 : f32
    %107 = vector.broadcast %cst_20 : f32 to vector<8x128xf32>
    %108 = arith.addf %106, %107 : vector<8x128xf32>
    %109 = arith.divf %81, %87 : vector<8x128xf32>
    %110 = arith.subf %108, %87 : vector<8x128xf32>
    %111 = arith.divf %110, %108 : vector<8x128xf32>
    %112 = arith.subf %109, %111 : vector<8x128xf32>
    %cst_21 = arith.constant 1.000000e+00 : f32
    %113 = vector.broadcast %cst_21 : f32 to vector<8x128xf32>
    %114 = arith.mulf %113, %52 : vector<8x128xf32>
    %115 = arith.addf %114, %25 : vector<8x128xf32>
    %cst_22 = arith.constant 0.000000e+00 : f32
    %116 = vector.broadcast %cst_22 : f32 to vector<8x128xf32>
    %117 = arith.subf %116, %112 : vector<8x128xf32>
    %cst_23 = arith.constant 1.000000e+00 : f32
    %118 = vector.broadcast %cst_23 : f32 to vector<8x128xf32>
    %119 = arith.mulf %118, %117 : vector<8x128xf32>
    %120 = arith.addf %115, %119 : vector<8x128xf32>
    %c0_24 = arith.constant 0 : index
    %c0_25 = arith.constant 0 : index
    %c0_26 = arith.constant 0 : index
    %121 = vector.load %arg6[%c0_24, %c0_25, %c0_26] : memref<1x8x128xf32, #tpu.memory_space<vmem>>, vector<1x8x128xf32>
    %122 = vector.shape_cast %121 : vector<1x8x128xf32> to vector<8x128xf32>
    %123 = vector.shape_cast %120 : vector<8x128xf32> to vector<1x8x128xf32>
    tpu.vector_store %arg6[%c0_24, %c0_25, %c0_26], %123 {strides = array<i32>} : memref<1x8x128xf32, #tpu.memory_space<vmem>>, vector<1x8x128xf32>,
    return
  }
  func.func @transform_0(%arg0: i32, %arg1: i32) -> (i32, i32, i32) {
    %c0_i32 = arith.constant 0 : i32
    %c0_i32_0 = arith.constant 0 : i32
    return %arg0, %arg1, %c0_i32 : i32, i32, i32
  }
  func.func @transform_1(%arg0: i32, %arg1: i32) -> (i32, i32, i32) {
    %c0_i32 = arith.constant 0 : i32
    %c0_i32_0 = arith.constant 0 : i32
    return %arg0, %arg1, %c0_i32 : i32, i32, i32
  }
  func.func @transform_2(%arg0: i32, %arg1: i32) -> (i32, i32, i32) {
    %c0_i32 = arith.constant 0 : i32
    %c0_i32_0 = arith.constant 0 : i32
    %c0_i32_1 = arith.constant 0 : i32
    return %arg0, %c0_i32, %c0_i32_0 : i32, i32, i32
  }
  func.func @transform_3(%arg0: i32, %arg1: i32) -> (i32, i32, i32) {
    %c0_i32 = arith.constant 0 : i32
    %c0_i32_0 = arith.constant 0 : i32
    %c0_i32_1 = arith.constant 0 : i32
    return %arg0, %c0_i32, %c0_i32_0 : i32, i32, i32
  }
  func.func @transform_4(%arg0: i32, %arg1: i32) -> (i32, i32, i32) {
    %c0_i32 = arith.constant 0 : i32
    %c0_i32_0 = arith.constant 0 : i32
    return %arg0, %arg1, %c0_i32 : i32, i32, i32
  }
}

</mosaic_0001>

<bundles_post_ra>
// kernel: _cost_matrix_padded.1
= control target key start
LH: loop header
LB: loop body
LE: loop exit
PB: predicated region body
PF: predicated region fallthrough
CT: control target
= control target key end

     0   :  { %9 = vsyncpa [#allocation3], 0  ;;  %s1153_s0 = inlined_call_operand.vmem [shape: f32[2,8,128], index: 0, kind: input, shape index: {}]   ;;  %s1154_s1 = inlined_call_operand.vmem [shape: f32[2,8,16], index: 1, kind: input, shape index: {}]   ;;  %s1155_s2 = inlined_call_operand.vmem [shape: bf16[2,128,128], index: 2, kind: input, shape index: {}]   ;;  %s1156_s3 = inlined_call_operand.vmem [shape: f32[2,16,128], index: 3, kind: input, shape index: {}]   ;;  %s1157_s4 = inlined_call_operand.hbm [shape: f32[2,8,128], index: 4, kind: output, shape index: {}]  }
   0x1   :  { %11 = vsyncpa [#allocation3 + $0x1], 0  ;;  %s984_s15 = smov 0   ;;  %s986_s16 = smov 0  }
   0x2   :  { %s988_s17 = smov 0   ;;  %s990_s18 = smov 0  }
   0x3   :  { %s992_s19 = smov 0   ;;  %s994_s20 = smov 0  }
   0x4 LB: > { %s690_s21 = sadd.s32 4294967295, %s945_s20   ;;  %s691_s22 = sadd.s32 4294967294, %s945_s20   ;;  %s945_s20 = sphi %s994_s20, %s17_s20   ;;  %s941_s19 = sphi %s992_s19, %s1164_s19   ;;  %s937_s18 = sphi %s990_s18, %s1163_s18   ;;  %s933_s17 = sphi %s988_s17, %s1162_s17   ;;  %s929_s16 = sphi %s986_s16, %s1161_s16   ;;  %s925_s15 = sphi %s984_s15, %s1160_s15  }
   0x5   : > { %s29_s23 = sadd.s32 1, %s941_s19  ;;  %s146_s24 = sadd.s32 1, %s933_s17 }
   0x6   : > { %p31_p0 = scmp.ge.s32.totalorder %s29_s23, 2  ;;  %p156_p1 = scmp.ne.s32.totalorder %s933_s17, %s929_s16 }
   0x7   : > { %p157_p2 = scmp.eq.s32.totalorder %s690_s21, 1  ;;  %p162_p3 = scmp.ne.s32.totalorder %s929_s16, %s925_s15 }
   0x8   : > { %s1166_s23 = smov (%p31_p0, %s29_s23), 0  ;;  %p163_p5 = scmp.eq.s32.totalorder %s691_s22, 1 }
   0x9   : > { %p1024_p4 = por %p157_p2, %p156_p1  ;;  %s141_s26 = ssub.s32 %s941_s19, %s1166_s23 }
   0xa   : > { %p694_p6 = scmp.ge.s32.totalorder %s945_s20, 1  ;;  %p144_p7 = scmp.eq.s32.totalorder %s141_s26, 0 }
   0xb   : > { %p1031_p8 = por %p163_p5, %p162_p3  ;;  %p217_p9 = scmp.lt.s32.totalorder %s945_s20, 3 }
   0xc   : > { %s1037_s28 = scalar_select %p144_p7, %s933_s17, %s146_s24  }
   0xd   : > { %p218_p10 = pnand %p694_p6, %p217_p9 }
   0xe   : > { %p262_p11 = scmp.lt.s32.totalorder (!%p218_p10), %s937_s18, 1  ;;  %v947_v0 = vmov (!%p218_p10), 4   ;;  %v948_v1 = vmov (!%p218_p10), 0.0   ;;  %v949_v6 = vmov (!%p218_p10), 7   ;;  %v950_v8 = vmov (!%p218_p10), 5  }
   0xf   : > { %221 = sbr.rel (%p218_p10) target bundleno = 426 (0x1aa), region = 36  ;;  %842 = vset.pattern.permute.xlu1 (!%p218_p10), %v947_v0  ;;  %754 = vmatprep.subr.bf16.mxu0 (!%p218_p10), %v948_v1  ;;  %v951_v10 = vmov (!%p218_p10), 0   ;;  %v952_v13 = vmov (!%p218_p10), 6   ;;  %vm953_vm0 = vmmov (!%p218_p10), 0   ;;  %v954_v16 = vmov (!%p218_p10), 8  }
  0x10   : > { %734 = vmatprep.subr.bf16.mxu1 (!%p218_p10), %v948_v1  ;;  %841 = vset.pattern.permute.xlu0 (!%p218_p10), %v952_v13  ;;  %v955_v17 = vmov (!%p218_p10), 1   ;;  %v956_v18 = vmov (!%p218_p10), 3   ;;  %v957_v19 = vmov (!%p218_p10), 2   ;;  %v454_v28 = vlaneseq (!%p218_p10) }
  0x11   : > { %770 = vmatprep.mubr.msk.bf16.mxu0 (!%p218_p10), %vm953_vm0, %v948_v1  ;;  %750 = vmatprep.mubr.msk.bf16.mxu1 (!%p218_p10), %vm953_vm0, %v948_v1 }
  0x12   : > { %v455_v30 = vshrl.u32 (!%p218_p10), %v454_v28, 7 }
  0x14   : > { %v508_v32 = vsub.s32 (!%p218_p10), 4, %v455_v30  ;;  %v519_v33 = vsub.s32 (!%p218_p10), 7, %v455_v30  ;;  %v528_v34 = vsub.s32 (!%p218_p10), 5, %v455_v30  ;;  %v499_v35 = vsub.s32 (!%p218_p10), 6, %v455_v30 }
  0x15   : > { %v456_v53 = vsub.s32 (!%p218_p10), 0, %v455_v30 }
  0x16   : > { %s1041_s29 = scalar_select %p262_p11, %s937_s18, 1 }
  0x18   : > { %s696_s30 = sshll.u32 %s1041_s29, 3  ;;  %s714_s5 = sshll.u32 %s1041_s29, 6 }
  0x19   : > { %s268_s8 = scalar_lea.vmem %s1153_s0, %s696_s30  ;;  %s275_s11 = scalar_lea.vmem %s1154_s1, %s696_s30 }
  0x1a   : > { %s1056_s14 = scalar_lea.vmem %s1155_s2, %s714_s5  ;;  %v1058_v2 = vld [vmem:[%s268_s8] sm:$0xff]  ;;  %s715_s21 = sshll.u32 %s1041_s29, 4 }
  0x1b   : > { %v1060_v3 = vld [vmem:[%s275_s11] sm:$0xff]  ;;  %307 = vmax.xlane.f32.xlu0 %v1058_v2  ;;  %v852_v5 = vld [vmem:[%s1056_s14 + $0x8] sm:$0xff]   ;;  %v853_v7 = vld [vmem:[%s1056_s14 + $0x10] sm:$0xff]   ;;  %s285_s26 = scalar_lea.vmem %s1156_s3, %s715_s21  ;;  %s259_s29 = sand.u32 1, %s929_s16  }
  0x1c   : > { %503 = vperm.xlu1 %842, %v1060_v3   ;;  %v851_v4 = vld [vmem:[%s1056_s14] sm:$0xff]   ;;  %v854_v9 = vld [vmem:[%s1056_s14 + $0x18] sm:$0xff]   ;;  %v856_v12 = vld [vmem:[%s1056_s14 + $0x28] sm:$0xff]   ;;  %s695_s30 = sshll.u32 %s259_s29, 3  ;;  %s711_s5 = sshll.u32 %s937_s18, 7 }
  0x1d   : > { %755 = vmatpush3.bf16.msra.mxu0 %v851_v4  ;;  %735 = vmatpush3.bf16.msra.mxu1 %v851_v4  ;;  %v855_v11 = vld [vmem:[%s1056_s14 + $0x20] sm:$0xff]   ;;  %v857_v14 = vld [vmem:[%s1056_s14 + $0x30] sm:$0xff]   ;;  %v858_v15 = vld [vmem:[%s1056_s14 + $0x38] sm:$0xff]   ;;  %s261_s6 = scalar_lea.vmem [#allocation2], %s695_s30  ;;  %s1106_s10 = scalar_lea.hbm %s1157_s4, %s711_s5 }
  0x1e   : > { %756 = vmatprep.subr.bf16.mxu0 %v948_v1  ;;  %736 = vmatprep.subr.bf16.mxu1 %v948_v1  ;;  %v305_v36 = vld [vmem:[%s285_s26] sm:$0xff]  ;;  %v306_v54 = vld [vmem:[%s285_s26 + $0x8] sm:$0xff]  ;;  %s580_s7 = sshll.u32 %s261_s6, 4  ;;  %s566_s11 = scalar_lea.sflag [#allocation3], %s259_s29  ;;  %s1108_s7 = int_to_ptr.vmem [resolvable:$true] %s580_s7 }
  0x1f   : > { %v509_v37 = vrot.slane %v305_v36, %v508_v32  ;;  %v520_v38 = vrot.slane %v305_v36, %v519_v33  ;;  %v529_v39 = vrot.slane %v305_v36, %v528_v34  ;;  %v500_v40 = vrot.slane %v305_v36, %v499_v35  ;;  %s867_s12 = scalar_lea.vmem %s1108_s7, 128  ;;  %s958_s18 = smov [#allocation2]  }
  0x20   : > { %843 = vset.pattern.permute.xlu1 %v949_v6  ;;  %v541_v59 = vrot.slane %v306_v54, %v456_v53  ;;  %p868_p12 = scmp.ne.s32.totalorder %s1108_s7, %s867_s12  ;;  %s871_s13 = sshll.u32 %s958_s18, 4  ;;  %s872_s13 = int_to_ptr.vmem [resolvable:$false] %s871_s13 }
  0x21   : > { %514 = vperm.xlu1 %843, %v1060_v3   ;;  %757 = vmatpush3.bf16.msra.mxu0 %v852_v5  ;;  %s873_s14 = scalar_lea.vmem %s872_s13, 256  ;;  %p874_p1 = scmp.lt.s32.totalorder %s1108_s7, %s872_s13 }
  0x22   : > { %737 = vmatpush3.bf16.msra.mxu1 %v852_v5  ;;  %758 = vmatprep.subr.bf16.mxu0 %v948_v1  ;;  %v466_v5 = vsub.s32 1, %v455_v30  ;;  %p869_p13 = pnand %p868_p12, %p1024_p4  ;;  %p875_p2 = scmp.lt.s32.totalorder %s873_s14, %s867_s12 }
  0x23   : > { %738 = vmatprep.subr.bf16.mxu1 %v948_v1 }
  0x24   : > { %p870_p0 = pneg %p869_p13  ;;  %p876_p3 = por %p875_p2, %p874_p1 }
  0x25   : > { %844 = vset.pattern.permute.xlu1 %v950_v8  ;;  %759 = vmatpush3.bf16.msra.mxu0 %v853_v7  ;;  %v457_v8 = vrot.slane %v305_v36, %v456_v53 }
  0x26   : > { %523 = vperm.xlu1 %844, %v1060_v3   ;;  %760 = vmatprep.subr.bf16.mxu0 %v948_v1  ;;  %p877_p5 = pnand %p876_p3, %p870_p0 }
  0x27   : > { %739 = vmatpush3.bf16.msra.mxu1 %v853_v7 }
  0x28   : > { %740 = vmatprep.subr.bf16.mxu1 %v948_v1 }
  0x29   : > { %761 = vmatpush3.bf16.msra.mxu0 %v854_v9 }
  0x2a   : > { %846 = vset.pattern.permute.xlu1 %v951_v10  ;;  %762 = vmatprep.subr.bf16.mxu0 %v948_v1  ;;  %v477_v10 = vsub.s32 2, %v455_v30 }
  0x2b   : > { %451 = vperm.xlu1 %846, %v1060_v3   ;;  %741 = vmatpush3.bf16.msra.mxu1 %v854_v9  ;;  %v467_v9 = vrot.slane %v305_v36, %v466_v5 }
  0x2c   : > { %742 = vmatprep.subr.bf16.mxu1 %v948_v1 }
  0x2d   : > { %763 = vmatpush3.bf16.msra.mxu0 %v855_v11 }
  0x2e   : > { %764 = vmatprep.subr.bf16.mxu0 %v948_v1 }
  0x2f   : > { %743 = vmatpush3.bf16.msra.mxu1 %v855_v11  ;;  %849 = vset.pattern.permute.xlu1 %v956_v18 }
  0x30   : > { %744 = vmatprep.subr.bf16.mxu1 %v948_v1 }
  0x31   : > { %765 = vmatpush3.bf16.msra.mxu0 %v856_v12  ;;  %494 = vperm.xlu0 %841, %v1060_v3  }
  0x32   : > { %766 = vmatprep.subr.bf16.mxu0 %v948_v1 }
  0x33   : > { %745 = vmatpush3.bf16.msra.mxu1 %v856_v12 }
  0x34   : > { %746 = vmatprep.subr.bf16.mxu1 %v948_v1 }
  0x35   : > { %767 = vmatpush3.bf16.msra.mxu0 %v857_v14  ;;  %845 = vset.pattern.permute.xlu0 %v954_v16 }
  0x36   : > { %768 = vmatprep.subr.bf16.mxu0 %v948_v1  ;;  %535 = vperm.xlu0 %845, %v1060_v3  }
  0x37   : > { %747 = vmatpush3.bf16.msra.mxu1 %v857_v14  ;;  %v478_v14 = vrot.slane %v305_v36, %v477_v10 }
  0x38   : > { %748 = vmatprep.subr.bf16.mxu1 %v948_v1 }
  0x39   : > { %769 = vmatpush3.bf16.msra.mxu0 %v858_v15 }
  0x3a   : > { %847 = vset.pattern.permute.xlu0 %v955_v17 }
  0x3b   : > { %749 = vmatpush3.bf16.msra.mxu1 %v858_v15  ;;  %461 = vperm.xlu0 %847, %v1060_v3   ;;  %v488_v15 = vsub.s32 3, %v455_v30 }
  0x3f   : > { %848 = vset.pattern.permute.xlu0 %v957_v19 }
  0x40   : > { %472 = vperm.xlu0 %848, %v1060_v3  }
  0x44   : > { %850 = vset.pattern.permute.xlu0 %v954_v16 }
  0x9b   : > { %v504_v29 = vpop.permute.xlu1 %503 }
  0x9c   : > { %v510_v43 = vmax.f32 %v504_v29, %v509_v37  ;;  %v546_v47 = vmin.f32 %v504_v29, %v509_v37 }
  0xa0   : > { %v515_v31 = vpop.permute.xlu1 %514 }
  0xa1   : > { %v521_v44 = vmin.f32 %v515_v31, %v520_v38  ;;  %v549_v48 = vmax.f32 %v515_v31, %v520_v38 }
  0xa5   : > { %v524_v41 = vpop.permute.xlu1 %523 }
  0xa6   : > { %v530_v45 = vmax.f32 %v524_v41, %v529_v39  ;;  %v550_v49 = vmin.f32 %v524_v41, %v529_v39 }
  0xa8   : > { %v308_v20 = vpop.xlane.xlu0 %307  ;;  %v531_v51 = vsub.f32 %v521_v44, %v530_v45  ;;  %v551_v55 = vsub.f32 %v549_v48, %v550_v49 }
  0xa9   : > { %v309_v21 = vsub.f32 %v1058_v2, %v308_v20  ;;  %v489_v20 = vrot.slane %v305_v36, %v488_v15 }
  0xaa   : > { %v532_v57 = vmax.f32 %v531_v51, 0.0  ;;  %v552_v61 = vmax.f32 %v551_v55, 0.0  ;;  %v452_v4 = vpop.permute.xlu1 %451 }
  0xab   : > { %v310_v22 = vmul.f32 1.442695, %v309_v21  ;;  %v458_v12 = vsub.f32 %v452_v4, %v457_v8 }
  0xad   : > { %859 = vpow2.f32 %v310_v22  ;;  %v459_v17 = vand.u32 2147483647, %v458_v12 }
  0xb0   : > { %v495_v42 = vpop.permute.xlu0 %494 }
  0xb1   : > { %v501_v46 = vmin.f32 %v495_v42, %v500_v40  ;;  %v545_v50 = vmax.f32 %v495_v42, %v500_v40 }
  0xb3   : > { %v511_v52 = vsub.f32 %v501_v46, %v510_v43  ;;  %v547_v56 = vsub.f32 %v545_v50, %v546_v47 }
  0xb5   : > { %v512_v58 = vmax.f32 %v511_v52, 0.0  ;;  %v536_v60 = vpop.permute.xlu0 %535  ;;  %v548_v62 = vmax.f32 %v547_v56, 0.0 }
  0xb6   : > { %v542_v0 = vadd.f32 %v541_v59, %v536_v60 }
  0xb7   : > { %v860_v23 = vpop.eup %859  ;;  %v533_v63 = vmul.f32 %v532_v57, %v512_v58  ;;  %v553_v1 = vmul.f32 %v552_v61, %v548_v62 }
  0xb8   : > { %312 = vadd.xlane.f32.xlu1 %v860_v23  ;;  %v316_v24 = vpack.c.bf16 %v860_v23, %v860_v23 }
  0xb9   : > { %v543_v2 = vsub.f32 %v542_v0, %v533_v63 }
  0xba   : > { %v317_v25 = vunpack.c.l.bf16 %v316_v24  ;;  %771 = vmatmul.mubr.bf16.vlgmr.msra.gmra.mrb[0].mxu0 %v316_v24  ;;  %v462_v7 = vpop.permute.xlu0 %461 }
  0xbb   : > { %v544_v6 = vadd.f32 1e-06, %v543_v2  ;;  %v468_v13 = vsub.f32 %v462_v7, %v467_v9 }
  0xbc   : > { %v318_v26 = vsub.f32 %v860_v23, %v317_v25 }
  0xbd   : > { %v469_v18 = vand.u32 2147483647, %v468_v13 }
  0xbe   : > { %v319_v27 = vpack.c.bf16 %v318_v26, %v318_v26 }
  0xbf   : > { %v473_v16 = vpop.permute.xlu0 %472  ;;  %v470_v26 = vadd.f32 %v469_v18, %v459_v17 }
  0xc0   : > { %751 = vmatmul.mubr.bf16.vlgmr.msra.gmra.mrb[0].mxu1 %v319_v27  ;;  %v479_v19 = vsub.f32 %v473_v16, %v478_v14 }
  0xc2   : > { %v480_v27 = vand.u32 2147483647, %v479_v19 }
  0xc4   : > { %v481_v35 = vadd.f32 %v480_v27, %v470_v26 }
  0xc9   : > { %483 = vperm.xlu1 %849, %v1060_v3   ;;  %v554_v3 = vadd.f32 1e-06, %v553_v1 }
  0xcb   : > { %861 = vrcp.f32 %v554_v3  ;;  %v557_v23 = vsub.f32 %v554_v3, %v544_v6 }
  0xcc   : > { %863 = vrcp.f32 %v544_v6 }
  0xd5   : > { %v862_v22 = vpop.eup %861 }
  0xd6   : > { %v864_v24 = vpop.eup %863  ;;  %v559_v30 = vmul.f32 %v862_v22, %v557_v23 }
  0xd7   : > { %v556_v32 = vmul.f32 %v864_v24, %v533_v63 }
  0xd9   : > { %v560_v41 = vsub.f32 %v556_v32, %v559_v30 }
  0xdb   : > { %v562_v47 = vsub.f32 0.0, %v560_v41 }
 0x145   : > { %v313_v11 = vpop.xlane.xlu1 %312 }
 0x146   : > { %865 = vrcp.f32 %v313_v11 }
 0x149   : > { %v484_v21 = vpop.permute.xlu1 %483 }
 0x14a   : > { %v490_v28 = vsub.f32 %v484_v21, %v489_v20 }
 0x14c   : > { %v491_v37 = vand.u32 2147483647, %v490_v28 }
 0x14e   : > { %v492_v43 = vadd.f32 %v491_v37, %v481_v35 }
 0x150   : > { %v866_v34 = vpop.eup %865 }
 0x151   : > { %v315_v38 = vmul.f32 -1.0, %v866_v34 }
 0x18d   : > { %v442_v25 = vpop.f32.mrb[0].mxu0 }
 0x18e   : > { %v772_v29 = vpop.f32.mrb[1].mxu0 }
 0x18f   : > { %v445_v31 = vpop.f32.mrb[2].mxu0 }
 0x190   : > { %v773_v33 = vpop.f32.mrb[3].mxu0 }
 0x193   : > { %v402_v36 = vpop.f32.mrb[0].mxu1 }
 0x194   : > { %v443_v39 = vadd.f32 %v442_v25, %v402_v36  ;;  %v752_v40 = vpop.f32.mrb[1].mxu1 }
 0x195   : > { %v405_v42 = vpop.f32.mrb[2].mxu1 }
 0x196   : > { %v448_v44 = vmul.f32 %v443_v39, %v315_v38  ;;  %v753_v45 = vpop.f32.mrb[3].mxu1 }
 0x198   : > { %v561_v46 = vadd.f32 %v492_v43, %v448_v44 }
 0x19a   : > { %v563_v48 = vadd.f32 %v562_v47, %v561_v46 }
 0x19c   : > { %564 = vst [vmem:[%s261_s6] sm:$0xff] %v563_v48 }
 0x19d   : > { %880 = shalt.err (!%p877_p5)
}
 0x19e   : > { %s881_s21 = scalar_lea.hbm %s1106_s10, 128  ;;  %s885_s26 = scalar_lea.hbm %s1157_s4, 256 }
 0x19f   : > { %p882_p6 = scmp.ne.s32.totalorder %s1106_s10, %s881_s21  ;;  %p886_p10 = scmp.lt.u32.totalorder %s1106_s10, %s1157_s4 }
 0x1a0   : > { %p887_p11 = scmp.lt.u32.totalorder %s885_s26, %s881_s21  ;;  %p889_p13 = scmp.lt.u32.totalorder %s881_s21, %s1106_s10 }
 0x1a1   : > { %p883_p7 = pnand %p882_p6, %p1024_p4 }
 0x1a2   : > { %p888_p12 = por %p887_p11, %p886_p10 }
 0x1a3   : > { %p884_p9 = pneg %p883_p7 }
 0x1a4   : > { %p890_p0 = por %p889_p13, %p888_p12 }
 0x1a6   : > { %p891_p1 = pnand %p890_p0, %p884_p9 }
 0x1a8   : > { %894 = shalt.err (!%p891_p1)
}
 0x1a9   : > { %775 = dma.vmem_to_hbm [thread:$0]  (%p1024_p4), %s1108_s7, 128, %s1106_s10, %s566_s11  }
 0x1aa PF: > { %p781_p2 = scmp.ge.s32.totalorder %s945_s20, 2  ;;  %s592_s5 = sand.u32 1, %s925_s15  }
 0x1ab   : > { %s593_s6 = scalar_lea.sflag [#allocation3], %s592_s5 }
 0x1ac   : > { %p778_p3 = pnand %p781_p2, %p1031_p8 }
 0x1ae   : > { %920 = dma.done.wait (!%p778_p3), %s593_s6, 128  }
 0x1af   : > { %922 = vsyncadd (!%p778_p3), %s593_s6, 4294967168  ;;  %s17_s20 = sadd.s32 1, %s945_s20   ;;  %s1160_s15 = smov %s929_s16 }
 0x1b0   : > { %p14_p5 = scmp.ge.s32.totalorder %s17_s20, 4   ;;  %s1161_s16 = smov %s933_s17 }
 0x1b1   : > { %s1162_s17 = smov %s1037_s28  ;;  %s1163_s18 = smov %s941_s19 }
 0x1b2   : > { %s1164_s19 = smov %s1166_s23  ;;  %16 = sbr.rel (!%p14_p5) target bundleno = 4 (0x4), region = 80 }
 0x1b9   :  { %598 = vsyncpa [#allocation3], 1 }
 0x1ba   :  { %600 = vsyncpa [#allocation3 + $0x1], 1 }

</bundles_post_ra>
